<compile_context>
chip_gen: v5e
topology: v5e:2x2
jax: 0.10.0
libtpu: 0.0.40
codegen_flags: <defaults>
</compile_context>

<pallas_src>
import jax
import jax.numpy as jnp
from jax.experimental import pallas as pl
from jax.experimental.pallas import tpu as pltpu

EPS = 1e-5
# per-tile f32 VMEM: x 256 KiB, hidden 2 MiB, out 64 KiB (+ double buffering)
MAX_TILE_B = 16384


def _round_up(n, m):
    return (n + m - 1) // m * m


def bs_ann_kernel(x_ref, w1_ref, b1_ref, w2_ref, b2_ref, w3_ref, b3_ref, out_ref):
    """Feature-major MLP tile: x [D, TB] -> hidden [H, TB] -> out [n_out, TB].

    BatchNorm is already folded into (w1, b1) by the wrapper.
    """
    x = x_ref[...]

    h = jnp.dot(w1_ref[...], x, preferred_element_type=jnp.float32) + b1_ref[...]
    h = jnp.maximum(h, 0.0)

    h = jnp.dot(w2_ref[...], h, preferred_element_type=jnp.float32) + b2_ref[...]
    h = jnp.maximum(h, 0.0)

    out_ref[...] = (
        jnp.dot(w3_ref[...], h, preferred_element_type=jnp.float32) + b3_ref[...]
    )


def black_scholes_ann_forward(x, params):
    """x: [B, D].  params use PyTorch layouts: w* are [out, in], b*/gamma/beta are [dim]."""
    B, D = x.shape
    H1 = params["w1"].shape[0]
    H2 = params["w2"].shape[0]
    n_out = params["w3"].shape[0]

    x = x.astype(jnp.float32)

    # --- BatchNorm1d (training mode) stats over the FULL batch, folded into layer 1 ---
    mean = jnp.mean(x, axis=0)                                  # [D]
    var = jnp.mean(jnp.square(x - mean), axis=0)                # biased variance, [D]
    scale = params["gamma"] * jax.lax.rsqrt(var + EPS)          # [D]
    shift = params["beta"] - mean * scale                       # [D]
    w1f = params["w1"] * scale[None, :]                         # [H1, D]
    b1f = params["w1"] @ shift + params["b1"]                   # [H1]

    # --- Feature-major / batch-on-lanes layout, pad batch only to a 128 multiple ---
    B_pad = _round_up(B, 128)
    tile_b = min(MAX_TILE_B, B_pad)
    x_t = jnp.zeros((D, B_pad), jnp.float32).at[:, :B].set(x.T)

    args = (
        x_t,
        w1f, b1f.reshape(H1, 1),
        params["w2"].astype(jnp.float32), params["b2"].reshape(H2, 1),
        params["w3"].astype(jnp.float32), params["b3"].reshape(n_out, 1),
    )

    const = lambda i: (0, 0)
    flops = 2 * B_pad * (D * H1 + H1 * H2 + H2 * n_out)
    bytes_accessed = 4 * (
        B_pad * (D + n_out) + H1 * D + H1 * H2 + H2 * n_out + H1 + H2 + n_out
    )

    out_t = pl.pallas_call(
        bs_ann_kernel,
        out_shape=jax.ShapeDtypeStruct((n_out, B_pad), jnp.float32),
        grid=(pl.cdiv(B_pad, tile_b),),
        in_specs=[
            pl.BlockSpec((D, tile_b), lambda i: (0, i)),   # x tile: batch on lanes
            pl.BlockSpec((H1, D), const),                   # weights/biases resident
            pl.BlockSpec((H1, 1), const),
            pl.BlockSpec((H2, H1), const),
            pl.BlockSpec((H2, 1), const),
            pl.BlockSpec((n_out, H2), const),
            pl.BlockSpec((n_out, 1), const),
        ],
        out_specs=pl.BlockSpec((n_out, tile_b), lambda i: (0, i)),
        compiler_params=pltpu.CompilerParams(
            dimension_semantics=("parallel",),
            vmem_limit_bytes=32 * 1024 * 1024,
        ),
        cost_estimate=pl.CostEstimate(
            flops=flops, transcendentals=0, bytes_accessed=bytes_accessed
        ),
    )(*args)

    # back to the PyTorch [B, n_out] convention, dropping the batch padding
    return out_t[:, :B].T


def init_params(key, neurons):
    """PyTorch-shaped parameters: Linear.weight [out, in] ~ U(+/- 1/sqrt(fan_in)),
    Linear.bias [out], BatchNorm gamma=1 / beta=0."""
    d_in, h1, h2, d_out = neurons
    keys = jax.random.split(key, 6)

    def linear(kw, kb, fan_in, fan_out):
        bound = 1.0 / (fan_in ** 0.5)
        w = jax.random.uniform(kw, (fan_out, fan_in), jnp.float32, -bound, bound)
        b = jax.random.uniform(kb, (fan_out,), jnp.float32, -bound, bound)
        return w, b

    w1, b1 = linear(keys[0], keys[1], d_in, h1)
    w2, b2 = linear(keys[2], keys[3], h1, h2)
    w3, b3 = linear(keys[4], keys[5], h2, d_out)

    return {
        "gamma": jnp.ones((d_in,), jnp.float32),
        "beta": jnp.zeros((d_in,), jnp.float32),
        "w1": w1, "b1": b1,
        "w2": w2, "b2": b2,
        "w3": w3, "b3": b3,
    }


def reference_forward(x, p):
    """Pure-JAX reference matching the PyTorch forward (training-mode BN)."""
    mean = jnp.mean(x, axis=0)
    var = jnp.mean((x - mean) ** 2, axis=0)
    h = (x - mean) * jax.lax.rsqrt(var + EPS) * p["gamma"] + p["beta"]
    h = jnp.maximum(h @ p["w1"].T + p["b1"], 0.0)
    h = jnp.maximum(h @ p["w2"].T + p["b2"], 0.0)
    return h @ p["w3"].T + p["b3"]


if __name__ == "__main__":
    # Small shapes consistent with the module: neurons = [d, hidden, hidden, 1]
    neurons = [4, 32, 32, 1]
    batch = 8

    key = jax.random.PRNGKey(0)
    kx, kp = jax.random.split(key)

    # "space_bounds"-style positive inputs (stock prices)
    x = jax.random.uniform(kx, (batch, neurons[0]), jnp.float32, 90.0, 110.0)
    params = init_params(kp, neurons)

    out = black_scholes_ann_forward(x, params)
    out = jax.block_until_ready(out)

    ref = reference_forward(x, params)
    assert out.shape == (batch, neurons[-1])
    assert jnp.allclose(out, ref, atol=1e-4, rtol=1e-4), "mismatch vs JAX reference"

    print("KERNEL_OK")
</pallas_src>

<mosaic_0001>
module attributes {stable_mosaic.version = 11 : i64} {
  func.func @bs_ann_kernel(%arg0: i32, %arg1: memref<4x128xf32, #tpu.memory_space<vmem>>, %arg2: memref<32x4xf32, #tpu.memory_space<vmem>>, %arg3: memref<32x1xf32, #tpu.memory_space<vmem>>, %arg4: memref<32x32xf32, #tpu.memory_space<vmem>>, %arg5: memref<32x1xf32, #tpu.memory_space<vmem>>, %arg6: memref<1x32xf32, #tpu.memory_space<vmem>>, %arg7: memref<1x1xf32, #tpu.memory_space<vmem>>, %arg8: memref<1x128xf32, #tpu.memory_space<vmem>>) attributes {dimension_semantics = [#tpu.dimension_semantics<parallel>], iteration_bounds = array<i64: 1>, scalar_prefetch = 0 : i64, scratch_operands = 0 : i64, tpu.core_type = #tpu.core_type<tc>, window_params = [{transform_indices = @transform_0, window_bounds = array<i64: 4, 128>}, {pipeline_mode = #tpu.pipeline_mode<synchronous>, transform_indices = @transform_1, window_bounds = array<i64: 32, 4>}, {pipeline_mode = #tpu.pipeline_mode<synchronous>, transform_indices = @transform_2, window_bounds = array<i64: 32, 1>}, {pipeline_mode = #tpu.pipeline_mode<synchronous>, transform_indices = @transform_3, window_bounds = array<i64: 32, 32>}, {pipeline_mode = #tpu.pipeline_mode<synchronous>, transform_indices = @transform_4, window_bounds = array<i64: 32, 1>}, {pipeline_mode = #tpu.pipeline_mode<synchronous>, transform_indices = @transform_5, window_bounds = array<i64: 1, 32>}, {pipeline_mode = #tpu.pipeline_mode<synchronous>, transform_indices = @transform_6, window_bounds = array<i64: 1, 1>}, {transform_indices = @transform_7, window_bounds = array<i64: 1, 128>}]} {
    %c0 = arith.constant 0 : index
    %c0_0 = arith.constant 0 : index
    %0 = vector.load %arg1[%c0, %c0_0] : memref<4x128xf32, #tpu.memory_space<vmem>>, vector<4x128xf32>
    %c0_1 = arith.constant 0 : index
    %c0_2 = arith.constant 0 : index
    %1 = vector.load %arg2[%c0_1, %c0_2] : memref<32x4xf32, #tpu.memory_space<vmem>>, vector<32x4xf32>
    %cst = arith.constant dense<0.000000e+00> : vector<32x128xf32>
    %2 = tpu.matmul %1, %0, %cst {dimension_numbers = #tpu.dot_dimension_numbers<[1], [0], [0], [1], [0, 0, 1, 1], [], []>} : vector<32x4xf32>, vector<4x128xf32>, vector<32x128xf32> -> vector<32x128xf32>
    %c0_3 = arith.constant 0 : index
    %c0_4 = arith.constant 0 : index
    %3 = vector.load %arg3[%c0_3, %c0_4] : memref<32x1xf32, #tpu.memory_space<vmem>>, vector<32x1xf32>
    %4 = vector.broadcast %3 : vector<32x1xf32> to vector<32x128xf32>
    %5 = arith.addf %2, %4 : vector<32x128xf32>
    %cst_5 = arith.constant 0.000000e+00 : f32
    %6 = vector.broadcast %cst_5 : f32 to vector<32x128xf32>
    %7 = arith.maximumf %5, %6 : vector<32x128xf32>
    %c0_6 = arith.constant 0 : index
    %c0_7 = arith.constant 0 : index
    %8 = vector.load %arg4[%c0_6, %c0_7] : memref<32x32xf32, #tpu.memory_space<vmem>>, vector<32x32xf32>
    %cst_8 = arith.constant dense<0.000000e+00> : vector<32x128xf32>
    %9 = tpu.matmul %8, %7, %cst_8 {dimension_numbers = #tpu.dot_dimension_numbers<[1], [0], [0], [1], [0, 0, 1, 1], [], []>} : vector<32x32xf32>, vector<32x128xf32>, vector<32x128xf32> -> vector<32x128xf32>
    %c0_9 = arith.constant 0 : index
    %c0_10 = arith.constant 0 : index
    %10 = vector.load %arg5[%c0_9, %c0_10] : memref<32x1xf32, #tpu.memory_space<vmem>>, vector<32x1xf32>
    %11 = vector.broadcast %10 : vector<32x1xf32> to vector<32x128xf32>
    %12 = arith.addf %9, %11 : vector<32x128xf32>
    %cst_11 = arith.constant 0.000000e+00 : f32
    %13 = vector.broadcast %cst_11 : f32 to vector<32x128xf32>
    %14 = arith.maximumf %12, %13 : vector<32x128xf32>
    %c0_12 = arith.constant 0 : index
    %c0_13 = arith.constant 0 : index
    %15 = vector.load %arg6[%c0_12, %c0_13] : memref<1x32xf32, #tpu.memory_space<vmem>>, vector<1x32xf32>
    %cst_14 = arith.constant dense<0.000000e+00> : vector<1x128xf32>
    %16 = tpu.matmul %15, %14, %cst_14 {dimension_numbers = #tpu.dot_dimension_numbers<[1], [0], [0], [1], [0, 0, 1, 1], [], []>} : vector<1x32xf32>, vector<32x128xf32>, vector<1x128xf32> -> vector<1x128xf32>
    %c0_15 = arith.constant 0 : index
    %c0_16 = arith.constant 0 : index
    %17 = vector.load %arg7[%c0_15, %c0_16] : memref<1x1xf32, #tpu.memory_space<vmem>>, vector<1x1xf32>
    %18 = vector.broadcast %17 : vector<1x1xf32> to vector<1x128xf32>
    %19 = arith.addf %16, %18 : vector<1x128xf32>
    %c0_17 = arith.constant 0 : index
    %c0_18 = arith.constant 0 : index
    %20 = vector.load %arg8[%c0_17, %c0_18] : memref<1x128xf32, #tpu.memory_space<vmem>>, vector<1x128xf32>
    tpu.vector_store %arg8[%c0_17, %c0_18], %19 {strides = array<i32>} : memref<1x128xf32, #tpu.memory_space<vmem>>, vector<1x128xf32>,
    return
  }
  func.func @transform_0(%arg0: i32) -> (i32, i32) {
    %c0_i32 = arith.constant 0 : i32
    %c0_i32_0 = arith.constant 0 : i32
    return %c0_i32, %arg0 : i32, i32
  }
  func.func @transform_1(%arg0: i32) -> (i32, i32) {
    %c0_i32 = arith.constant 0 : i32
    %c0_i32_0 = arith.constant 0 : i32
    %c0_i32_1 = arith.constant 0 : i32
    return %c0_i32, %c0_i32_0 : i32, i32
  }
  func.func @transform_2(%arg0: i32) -> (i32, i32) {
    %c0_i32 = arith.constant 0 : i32
    %c0_i32_0 = arith.constant 0 : i32
    %c0_i32_1 = arith.constant 0 : i32
    return %c0_i32, %c0_i32_0 : i32, i32
  }
  func.func @transform_3(%arg0: i32) -> (i32, i32) {
    %c0_i32 = arith.constant 0 : i32
    %c0_i32_0 = arith.constant 0 : i32
    %c0_i32_1 = arith.constant 0 : i32
    return %c0_i32, %c0_i32_0 : i32, i32
  }
  func.func @transform_4(%arg0: i32) -> (i32, i32) {
    %c0_i32 = arith.constant 0 : i32
    %c0_i32_0 = arith.constant 0 : i32
    %c0_i32_1 = arith.constant 0 : i32
    return %c0_i32, %c0_i32_0 : i32, i32
  }
  func.func @transform_5(%arg0: i32) -> (i32, i32) {
    %c0_i32 = arith.constant 0 : i32
    %c0_i32_0 = arith.constant 0 : i32
    %c0_i32_1 = arith.constant 0 : i32
    return %c0_i32, %c0_i32_0 : i32, i32
  }
  func.func @transform_6(%arg0: i32) -> (i32, i32) {
    %c0_i32 = arith.constant 0 : i32
    %c0_i32_0 = arith.constant 0 : i32
    %c0_i32_1 = arith.constant 0 : i32
    return %c0_i32, %c0_i32_0 : i32, i32
  }
  func.func @transform_7(%arg0: i32) -> (i32, i32) {
    %c0_i32 = arith.constant 0 : i32
    %c0_i32_0 = arith.constant 0 : i32
    return %c0_i32, %arg0 : i32, i32
  }
}

</mosaic_0001>

<bundles_post_ra>
// kernel: tpu_custom_call.1
= control target key start
LH: loop header
LB: loop body
LE: loop exit
PB: predicated region body
PF: predicated region fallthrough
CT: control target
= control target key end

     0   :  { %s387_s0 = inlined_call_operand.vmem [shape: f32[4,128], index: 0, kind: input, shape index: {}]   ;;  %s388_s1 = inlined_call_operand.vmem [shape: f32[32,4], index: 1, kind: input, shape index: {}]   ;;  %s389_s2 = inlined_call_operand.vmem [shape: f32[32,1], index: 2, kind: input, shape index: {}]   ;;  %s390_s3 = inlined_call_operand.vmem [shape: f32[32,32], index: 3, kind: input, shape index: {}]   ;;  %s391_s4 = inlined_call_operand.vmem [shape: f32[32,1], index: 4, kind: input, shape index: {}]   ;;  %s392_s5 = inlined_call_operand.vmem [shape: f32[1,32], index: 5, kind: input, shape index: {}]   ;;  %s393_s6 = inlined_call_operand.<no memory space> [shape: f32[1,1], index: 6, kind: input, shape index: {}]   ;;  %s394_s7 = inlined_call_operand.hbm [shape: f32[1,128], index: 7, kind: output, shape index: {}]  }
   0x1   :  { %v12_v0 = vstv %s393_s6 }
   0x2   :  { %13 = vst [vmem:[#allocation2] sm:$0x1] %v12_v0 }
   0x3   :  { %v29_v1 = vld [vmem:[%s387_s0] sm:$0xf]  ;;  %vm71_vm0 = vcmask 1043456   ;;  %vm58_vm1 = vcmask 31744   ;;  %v33_v3 = vld [vmem:[%s388_s1 + $0x18] sm:$0xff]  ;;  %v35_v5 = vld [vmem:[%s389_s2 + $0x8] sm:$0xff] }
   0x4   :  { %v30_v2 = vld [vmem:[%s388_s1] sm:$0xff]  ;;  %230 = vmatpush.msk.msra.mxu0 %vm71_vm0, %v29_v1  ;;  %240 = vmatpush.msk.msra.mxu2 %vm71_vm0, %v29_v1  ;;  %v37_v4 = vld [vmem:[%s389_s2 + $0x18] sm:$0xff]  ;;  %v276_v6 = vmov 0  }
   0x5   :  { %231 = vmatmul.msk.f32.vlgmr.msra.gmra.mxu0 %vm58_vm1, %v30_v2  ;;  %248 = vset.pattern.permute.xlu1 %v276_v6 }
   0x6   :  { %247 = vset.pattern.permute.xlu0 %v276_v6  ;;  %234 = vmatmul.msk.f32.vlgmr.msra.gmra.mxu2 %vm58_vm1, %v33_v3 }
   0x7   :  { %55 = vperm.xlu0 %247, %v37_v4   ;;  %45 = vperm.xlu1 %248, %v35_v5  }
   0x8   :  { %14 = vsyncpa [#allocation4], 0  ;;  %249 = vset.pattern.permute.xlu2 %v276_v6  ;;  %v31_v7 = vld [vmem:[%s388_s1 + $0x8] sm:$0xff]  ;;  %v36_v8 = vld [vmem:[%s389_s2 + $0x10] sm:$0xff]  ;;  %vm136_vm2 = vcmask 261120   ;;  %s277_s10 = smov [#allocation3]  }
   0x9   :  { %v34_v9 = vld [vmem:[%s389_s2] sm:$0xff]  ;;  %v32_v10 = vld [vmem:[%s388_s1 + $0x10] sm:$0xff]  ;;  %v113_v11 = vld [vmem:[%s391_s4 + $0x8] sm:$0xff]  ;;  %s219_s6 = sshll.u32 %s277_s10, 4  ;;  %s221_s12 = sshll.u32 %s394_s7, 4  ;;  %s220_s6 = int_to_ptr.vmem [resolvable:$true] %s219_s6  ;;  %s222_s12 = int_to_ptr.hbm [resolvable:$true] %s221_s12 }
   0xa   :  { %v112_v12 = vld [vmem:[%s391_s4] sm:$0xff]  ;;  %v115_v14 = vld [vmem:[%s391_s4 + $0x18] sm:$0xff]  ;;  %v114_v20 = vld [vmem:[%s391_s4 + $0x10] sm:$0xff] }
   0xb   :  { %133 = vperm.xlu2 %249, %v115_v14   ;;  %v183_v25 = vld [vmem:[#allocation2] sm:$0x1]  ;;  %v110_v33 = vld [vmem:[%s390_s3 + $0x10] sm:$0xff]  ;;  %v109_v34 = vld [vmem:[%s390_s3 + $0x8] sm:$0xff] }
   0xc   :  { %v108_v32 = vld [vmem:[%s390_s3] sm:$0xff]  ;;  %v111_v35 = vld [vmem:[%s390_s3 + $0x18] sm:$0xff] }
   0xd   :  { %232 = vmatmul.msk.f32.gmra.mxu0 %vm58_vm1, %v31_v7  ;;  %v182_v52 = vld [vmem:[%s392_s5] sm:$0x1] }
   0xf   :  { %50 = vperm.xlu0 %247, %v36_v8   ;;  %40 = vperm.xlu1 %248, %v34_v9  }
  0x13   :  { %128 = vperm.xlu2 %249, %v114_v20  }
  0x15   :  { %233 = vmatmul.msk.f32.gmra.mxu0 %vm58_vm1, %v32_v10 }
  0x17   :  { %123 = vperm.xlu0 %247, %v113_v11   ;;  %118 = vperm.xlu1 %248, %v112_v12  }
  0x1b   :  { %186 = vperm.xlu2 %249, %v183_v25  }
  0x65   :  { %v134_v36 = vpop.permute.xlu2 %133 }
  0x6d   :  { %v129_v39 = vpop.permute.xlu2 %128 }
  0x75   :  { %v187_v53 = vpop.permute.xlu2 %186 }
  0x76   :  { %v189_v54 = vperm.slane %v187_v53, 0 }
  0x79   :  { %v56_v15 = vpop.permute.xlu0 %55  ;;  %v46_v16 = vpop.permute.xlu1 %45 }
  0x81   :  { %v51_v22 = vpop.permute.xlu0 %50  ;;  %v41_v23 = vpop.permute.xlu1 %40 }
  0x82   :  { %v92_v13 = vpop.f32.mrf.mxu0 }
  0x83   :  { %v93_v28 = vadd.f32 %v92_v13, %v41_v23 }
  0x85   :  { %v104_v31 = vmax.f32 %v93_v28, 0.0 }
  0x89   :  { %v101_v17 = vpop.f32.mrf.mxu2  ;;  %v124_v44 = vpop.permute.xlu0 %123 }
  0x8a   :  { %v95_v18 = vpop.f32.mrf.mxu0  ;;  %v102_v19 = vadd.f32 %v101_v17, %v56_v15  ;;  %v119_v47 = vpop.permute.xlu1 %118 }
  0x8b   :  { %v96_v26 = vadd.f32 %v95_v18, %v46_v16 }
  0x8c   :  { %v107_v21 = vmax.f32 %v102_v19, 0.0 }
  0x8d   :  { %v105_v30 = vmax.f32 %v96_v26, 0.0 }
  0x8e   :  { %161 = vmatpush.msra.mxu1 %v107_v21  ;;  %241 = vmatpush.msra.mxu3 %v107_v21 }
  0x92   :  { %v98_v24 = vpop.f32.mrf.mxu0 }
  0x93   :  { %v99_v27 = vadd.f32 %v98_v24, %v51_v22 }
  0x95   :  { %v106_v29 = vmax.f32 %v99_v27, 0.0 }
  0x97   :  { %162 = vmatpush.msra.mxu1 %v106_v29  ;;  %242 = vmatpush.msra.mxu3 %v106_v29 }
  0x99   :  { %163 = vmatpush.msra.mxu1 %v105_v30  ;;  %243 = vmatpush.msra.mxu3 %v105_v30 }
  0x9b   :  { %164 = vmatpush.msra.mxu1 %v104_v31  ;;  %244 = vmatpush.msra.mxu3 %v104_v31 }
  0x9c   :  { %235 = vmatmul.msk.f32.vlgmr.msra.gmra.mxu1 %vm136_vm2, %v108_v32  ;;  %237 = vmatmul.msk.f32.vlgmr.msra.gmra.mxu3 %vm136_vm2, %v110_v33 }
  0xa4   :  { %236 = vmatmul.msk.f32.gmra.mxu1 %vm136_vm2, %v109_v34  ;;  %238 = vmatmul.msk.f32.gmra.mxu3 %vm136_vm2, %v111_v35 }
 0x119   :  { %v166_v37 = vpop.f32.mrf.mxu1 }
 0x11a   :  { %v167_v48 = vadd.f32 %v166_v37, %v119_v47 }
 0x11c   :  { %v178_v51 = vmax.f32 %v167_v48, 0.0 }
 0x11f   :  { %v172_v38 = vpop.f32.mrf.mxu3 }
 0x120   :  { %v173_v42 = vadd.f32 %v172_v38, %v129_v39 }
 0x121   :  { %v169_v40 = vpop.f32.mrf.mxu1 }
 0x122   :  { %v170_v45 = vadd.f32 %v169_v40, %v124_v44  ;;  %v180_v49 = vmax.f32 %v173_v42, 0.0 }
 0x124   :  { %v179_v50 = vmax.f32 %v170_v45, 0.0 }
 0x127   :  { %v175_v41 = vpop.f32.mrf.mxu3 }
 0x128   :  { %v176_v43 = vadd.f32 %v175_v41, %v134_v36 }
 0x12a   :  { %v181_v46 = vmax.f32 %v176_v43, 0.0 }
 0x12c   :  { %205 = vmatpush.msrb.mxu2 %v181_v46 }
 0x12e   :  { %206 = vmatpush.msrb.mxu2 %v180_v49 }
 0x130   :  { %207 = vmatpush.msrb.mxu2 %v179_v50 }
 0x132   :  { %208 = vmatpush.msrb.mxu2 %v178_v51 }
 0x133   :  { %239 = vmatmul.msk.f32.vlgmr.msrb.gmra.mxu2 %vm136_vm2, %v182_v52 }
 0x1b6   :  { %v210_v55 = vpop.f32.mrf.mxu2 }
 0x1b7   :  { %v211_v56 = vadd.f32 %v210_v55, %v189_v54 }
 0x1b9   :  { %213 = vst [vmem:[#allocation3] sm:$0x1] %v211_v56 }
 0x1ba   :  { %224 = dma.vmem_to_hbm [thread:$0]  %s220_s6, 16, %s222_s12, [#allocation4]  }
 0x1bb   :  { %274 = dma.done.wait [#allocation4], 16  }
 0x1bc   :  { %275 = vsyncadd [#allocation4], 4294967280 }
 0x1bd   :  { %229 = vsyncpa [#allocation4], 1 }

</bundles_post_ra>
